<compile_context>
chip_gen: v5e
topology: v5e:2x2
jax: 0.10.0
libtpu: 0.0.40
codegen_flags: <defaults>
</compile_context>

<pallas_src>
import functools

import jax
import jax.numpy as jnp
from jax.experimental import pallas as pl
from jax.experimental.pallas import tpu as pltpu


def _round_up(x, m):
    return ((x + m - 1) // m) * m


def _conv_bn_relu_kernel(a_ref, w_ref, shift_ref, o_ref):
    # a_ref:     (TM, Kp)   bf16 im2col patch tile
    # w_ref:     (Kp, OCp)  bf16 conv weight with BN scale folded in
    # shift_ref: (1,  OCp)  f32 folded BN shift
    # o_ref:     (TM, OCp)  f32 output tile (lane-dense: OCp % 128 == 0)
    acc = jnp.dot(a_ref[...], w_ref[...], preferred_element_type=jnp.float32)
    o_ref[...] = jnp.maximum(acc + shift_ref[...], 0.0).astype(o_ref.dtype)


def _im2col(x, kh, kw, stride, padding, dilation):
    """x: NCHW -> (N*OH*OW, C*KH*KW), plus (OH, OW)."""
    n, c, h, w = x.shape
    xp = jnp.pad(x, ((0, 0), (0, 0), (padding, padding), (padding, padding)))
    oh = (h + 2 * padding - dilation * (kh - 1) - 1) // stride + 1
    ow = (w + 2 * padding - dilation * (kw - 1) - 1) // stride + 1
    patches = []
    for i in range(kh):
        for j in range(kw):
            hi = i * dilation
            wj = j * dilation
            patches.append(
                xp[:, :, hi:hi + stride * oh:stride, wj:wj + stride * ow:stride]
            )
    # (N, C, KH*KW, OH, OW) with k-index = c*(KH*KW) + (i*KW + j)
    p = jnp.stack(patches, axis=2).reshape(n, c * kh * kw, oh, ow)
    p = p.transpose(0, 2, 3, 1).reshape(n * oh * ow, c * kh * kw)
    return p, oh, ow


@functools.partial(jax.jit, static_argnames=("stride", "padding", "dilation"))
def basic_conv_forward(x, weight, gamma, beta, running_mean, running_var,
                       stride=1, padding=0, dilation=1):
    """x: (N, C_in, H, W) float32; weight: (C_out, C_in, KH, KW)."""
    eps = 1e-5
    n, c_in, _, _ = x.shape
    c_out, _, kh, kw = weight.shape

    a, oh, ow = _im2col(x, kh, kw, stride, padding, dilation)      # (M, K) f32
    m, k = a.shape

    # Fold BN (inference) into the weights; keep the shift in f32.
    inv_std = gamma / jnp.sqrt(running_var + eps)                  # (C_out,)
    w_mat = weight.reshape(c_out, c_in * kh * kw).T * inv_std[None, :]
    shift = beta - running_mean * inv_std                          # (C_out,)

    # ---- TPU-friendly padding -------------------------------------------
    LANE = 128
    oc_pad = _round_up(c_out, LANE)    # lane-dense output stores / MXU tiles
    k_pad = _round_up(k, 8)            # sublane-clean weight layout (not 128!)

    # M tile: large tiles amortize per-step overhead; keep >=2 grid steps so
    # the parallel axis can shard across v7x's two TensorCores.
    tm = 512
    while tm > 128 and pl.cdiv(m, tm) < 2:
        tm //= 2
    m_pad = _round_up(m, tm)

    a = jnp.pad(a, ((0, m_pad - m), (0, k_pad - k))).astype(jnp.bfloat16)
    w_mat = jnp.pad(w_mat, ((0, k_pad - k), (0, oc_pad - c_out))).astype(jnp.bfloat16)
    shift = jnp.pad(shift, (0, oc_pad - c_out)).reshape(1, oc_pad).astype(jnp.float32)

    grid = (m_pad // tm,)
    cost = pl.CostEstimate(
        flops=2 * m_pad * k_pad * oc_pad,
        transcendentals=0,
        bytes_accessed=(a.size * 2 + w_mat.size * 2 + shift.size * 4
                        + m_pad * oc_pad * 4),
    )

    out = pl.pallas_call(
        _conv_bn_relu_kernel,
        out_shape=jax.ShapeDtypeStruct((m_pad, oc_pad), jnp.float32),
        grid_spec=pltpu.PrefetchScalarGridSpec(
            num_scalar_prefetch=0,
            grid=grid,
            in_specs=[
                pl.BlockSpec((tm, k_pad), lambda i: (i, 0)),
                pl.BlockSpec((k_pad, oc_pad), lambda i: (0, 0)),
                pl.BlockSpec((1, oc_pad), lambda i: (0, 0)),
            ],
            out_specs=pl.BlockSpec((tm, oc_pad), lambda i: (i, 0)),
        ),
        compiler_params=pltpu.CompilerParams(
            dimension_semantics=("parallel",),
            vmem_limit_bytes=32 * 1024 * 1024,   # safe on v5e/v6e/v7x; usage ~1 MiB
        ),
        cost_estimate=cost,
    )(a, w_mat, shift)

    out = out[:m, :c_out]                                          # drop padding
    out = out.reshape(n, oh, ow, c_out).transpose(0, 3, 1, 2)      # NCHW
    return out


def _reference(x, weight, gamma, beta, running_mean, running_var,
               stride, padding, dilation):
    eps = 1e-5
    y = jax.lax.conv_general_dilated(
        x, weight,
        window_strides=(stride, stride),
        padding=((padding, padding), (padding, padding)),
        rhs_dilation=(dilation, dilation),
        dimension_numbers=("NCHW", "OIHW", "NCHW"),
    )
    scale = (gamma / jnp.sqrt(running_var + eps)).reshape(1, -1, 1, 1)
    shift = (beta - running_mean * gamma / jnp.sqrt(running_var + eps)).reshape(1, -1, 1, 1)
    return jnp.maximum(y * scale + shift, 0.0)


if __name__ == "__main__":
    key = jax.random.PRNGKey(0)
    k_x, k_w, k_g, k_b, k_m, k_v = jax.random.split(key, 6)

    # BasicConv(in_planes=4, out_planes=8, kernel_size=3, stride=1, padding=1)
    N, C_IN, H, W = 2, 4, 16, 16
    C_OUT, KH, KW = 8, 3, 3
    STRIDE, PADDING, DILATION = 1, 1, 1

    x = jax.random.normal(k_x, (N, C_IN, H, W), dtype=jnp.float32)
    weight = jax.random.normal(k_w, (C_OUT, C_IN, KH, KW), dtype=jnp.float32) * 0.1
    gamma = jax.random.normal(k_g, (C_OUT,), dtype=jnp.float32) * 0.1 + 1.0
    beta = jax.random.normal(k_b, (C_OUT,), dtype=jnp.float32) * 0.1
    running_mean = jax.random.normal(k_m, (C_OUT,), dtype=jnp.float32) * 0.1
    running_var = jax.nn.softplus(jax.random.normal(k_v, (C_OUT,), dtype=jnp.float32)) + 0.5

    out = basic_conv_forward(x, weight, gamma, beta, running_mean, running_var,
                             stride=STRIDE, padding=PADDING, dilation=DILATION)
    out = jax.block_until_ready(out)

    ref = _reference(x, weight, gamma, beta, running_mean, running_var,
                     STRIDE, PADDING, DILATION)
    assert out.shape == (N, C_OUT, H, W), out.shape
    # bf16 MXU inputs (f32 accumulation): tolerance matches bf16 mantissa.
    max_err = float(jnp.max(jnp.abs(out - ref)))
    assert jnp.allclose(out, ref, rtol=2e-2, atol=2e-2), (
        f"mismatch vs reference, max abs err {max_err}")

    print("KERNEL_OK")
</pallas_src>

<mosaic_0001>
module attributes {stable_mosaic.version = 11 : i64} {
  func.func @_conv_bn_relu_kernel(%arg0: i32, %arg1: memref<256x40xbf16, #tpu.memory_space<vmem>>, %arg2: memref<40x128xbf16, #tpu.memory_space<vmem>>, %arg3: memref<1x128xf32, #tpu.memory_space<vmem>>, %arg4: memref<256x128xf32, #tpu.memory_space<vmem>>) attributes {dimension_semantics = [#tpu.dimension_semantics<parallel>], iteration_bounds = array<i64: 2>, scalar_prefetch = 0 : i64, scratch_operands = 0 : i64, tpu.core_type = #tpu.core_type<tc>, window_params = [{transform_indices = @transform_0, window_bounds = array<i64: 256, 40>}, {pipeline_mode = #tpu.pipeline_mode<synchronous>, transform_indices = @transform_1, window_bounds = array<i64: 40, 128>}, {pipeline_mode = #tpu.pipeline_mode<synchronous>, transform_indices = @transform_2, window_bounds = array<i64: 1, 128>}, {transform_indices = @transform_3, window_bounds = array<i64: 256, 128>}]} {
    %c0 = arith.constant 0 : index
    %c0_0 = arith.constant 0 : index
    %0 = vector.load %arg1[%c0, %c0_0] : memref<256x40xbf16, #tpu.memory_space<vmem>>, vector<256x40xbf16>
    %c0_1 = arith.constant 0 : index
    %c0_2 = arith.constant 0 : index
    %1 = vector.load %arg2[%c0_1, %c0_2] : memref<40x128xbf16, #tpu.memory_space<vmem>>, vector<40x128xbf16>
    %cst = arith.constant dense<0.000000e+00> : vector<256x128xf32>
    %2 = tpu.matmul %0, %1, %cst {dimension_numbers = #tpu.dot_dimension_numbers<[1], [0], [0], [1], [0, 0, 1, 1], [], []>} : vector<256x40xbf16>, vector<40x128xbf16>, vector<256x128xf32> -> vector<256x128xf32>
    %c0_3 = arith.constant 0 : index
    %c0_4 = arith.constant 0 : index
    %3 = vector.load %arg3[%c0_3, %c0_4] : memref<1x128xf32, #tpu.memory_space<vmem>>, vector<1x128xf32>
    %4 = vector.broadcast %3 : vector<1x128xf32> to vector<256x128xf32>
    %5 = arith.addf %2, %4 : vector<256x128xf32>
    %cst_5 = arith.constant 0.000000e+00 : f32
    %6 = vector.broadcast %cst_5 : f32 to vector<256x128xf32>
    %7 = arith.maximumf %5, %6 : vector<256x128xf32>
    %c0_6 = arith.constant 0 : index
    %c0_7 = arith.constant 0 : index
    %8 = vector.load %arg4[%c0_6, %c0_7] : memref<256x128xf32, #tpu.memory_space<vmem>>, vector<256x128xf32>
    tpu.vector_store %arg4[%c0_6, %c0_7], %7 {strides = array<i32>} : memref<256x128xf32, #tpu.memory_space<vmem>>, vector<256x128xf32>,
    return
  }
  func.func @transform_0(%arg0: i32) -> (i32, i32) {
    %c0_i32 = arith.constant 0 : i32
    %c0_i32_0 = arith.constant 0 : i32
    return %arg0, %c0_i32 : i32, i32
  }
  func.func @transform_1(%arg0: i32) -> (i32, i32) {
    %c0_i32 = arith.constant 0 : i32
    %c0_i32_0 = arith.constant 0 : i32
    %c0_i32_1 = arith.constant 0 : i32
    return %c0_i32, %c0_i32_0 : i32, i32
  }
  func.func @transform_2(%arg0: i32) -> (i32, i32) {
    %c0_i32 = arith.constant 0 : i32
    %c0_i32_0 = arith.constant 0 : i32
    %c0_i32_1 = arith.constant 0 : i32
    return %c0_i32, %c0_i32_0 : i32, i32
  }
  func.func @transform_3(%arg0: i32) -> (i32, i32) {
    %c0_i32 = arith.constant 0 : i32
    %c0_i32_0 = arith.constant 0 : i32
    return %arg0, %c0_i32 : i32, i32
  }
}

</mosaic_0001>

<bundles_post_ra>
// kernel: basic_conv_forward.1
= control target key start
LH: loop header
LB: loop body
LE: loop exit
PB: predicated region body
PF: predicated region fallthrough
CT: control target
= control target key end

     0   :  { %s736_s12 = smov 0   ;;  %s871_s0 = inlined_call_operand.vmem [shape: bf16[512,40], index: 0, kind: input, shape index: {}]   ;;  %s872_s1 = inlined_call_operand.vmem [shape: bf16[40,128], index: 1, kind: input, shape index: {}]   ;;  %s873_s2 = inlined_call_operand.vmem [shape: f32[1,128], index: 2, kind: input, shape index: {}]   ;;  %s874_s3 = inlined_call_operand.vmem [shape: f32[512,128], index: 3, kind: output, shape index: {}]  }
   0x1 LB: > { %s573_s13 = sadd.s32 4294967295, %s714_s12   ;;  %p577_p0 = scmp.ge.s32.totalorder %s714_s12, 1  ;;  %s714_s12 = sphi %s736_s12, %s13_s12  }
   0x2   : > { %p138_p1 = scmp.lt.s32.totalorder %s714_s12, 3 }
   0x4   : > { %p139_p2 = pnand %p577_p0, %p138_p1 }
   0x5   : > { %s578_s16 = sshll.u32 (!%p139_p2), %s573_s13, 5 }
   0x6   : > { %142 = sbr.rel (%p139_p2) target bundleno = 223 (0xdf), region = 32  ;;  %p163_p3 = scmp.lt.s32.totalorder (!%p139_p2), %s578_s16, 63 }
   0xb   : > { %v211_v0 = vld [vmem:[%s872_s1 + $0x10] sm:$0xf]  ;;  %vm360_vm0 = vcmask 1043456   ;;  %s876_s16 = smov (!%p163_p3, %s578_s16), 63  ;;  %v689_v4 = vld [vmem:[%s872_s1 + $0x8] sm:$0xff]  ;;  %v688_v5 = vld [vmem:[%s872_s1] sm:$0xff] }
   0xc   : > { %v305_v1 = vunpack.c.l.b16 %v211_v0  ;;  %s579_s19 = sshll.u32 %s876_s16, 2  ;;  %vm311_vm1 = vcmask 326656   ;;  %v796_v22 = vld [vmem:[%s873_s2] ss:$0 sm:$0xff]  ;;  %s581_s27 = sshll.u32 %s876_s16, 3 }
   0xd   : > { %s759_s24 = scalar_lea.vmem %s871_s0, %s579_s19  ;;  %s804_s30 = scalar_lea.vmem %s874_s3, %s581_s27 }
   0xe   : > { %v308_v2 = vpack.c.b16 %v305_v1, %v305_v1  ;;  %v672_v6 = vld [vmem:[%s759_s24] sm:$0xff]  ;;  %v673_v10 = vld [vmem:[%s759_s24 + $0x8] sm:$0xff]  ;;  %v674_v14 = vld [vmem:[%s759_s24 + $0x10] sm:$0xff] }
   0xf   : > { %v676_v7 = vld [vmem:[%s759_s24 + $0x20] sm:$0xff]  ;;  %v677_v11 = vld [vmem:[%s759_s24 + $0x28] sm:$0xff]  ;;  %v678_v15 = vld [vmem:[%s759_s24 + $0x30] sm:$0xff] }
  0x10   : > { %v362_v3 = vsel %vm360_vm0, %v308_v2, 0  ;;  %v680_v8 = vld [vmem:[%s759_s24 + $0x40] sm:$0xff]  ;;  %v681_v12 = vld [vmem:[%s759_s24 + $0x48] sm:$0xff]  ;;  %v682_v16 = vld [vmem:[%s759_s24 + $0x50] sm:$0xff] }
  0x11   : > { %369 = vmatpush.bf16.msra.mxu0 %v362_v3  ;;  %690 = vmatpush.bf16.msra.mxu1 %v362_v3  ;;  %v684_v9 = vld [vmem:[%s759_s24 + $0x60] sm:$0xff]  ;;  %v685_v13 = vld [vmem:[%s759_s24 + $0x68] sm:$0xff]  ;;  %v686_v17 = vld [vmem:[%s759_s24 + $0x70] sm:$0xff] }
  0x12   : > { %691 = vmatpush.bf16.msra.mxu2 %v362_v3  ;;  %692 = vmatpush.bf16.msra.mxu3 %v362_v3  ;;  %v675_v18 = vld [vmem:[%s759_s24 + $0x18] sm:$0xff] }
  0x13   : > { %v679_v19 = vld [vmem:[%s759_s24 + $0x38] sm:$0xff] }
  0x14   : > { %v683_v20 = vld [vmem:[%s759_s24 + $0x58] sm:$0xff] }
  0x15   : > { %370 = vmatpush.bf16.msra.mxu0 %v689_v4  ;;  %693 = vmatpush.bf16.msra.mxu1 %v689_v4  ;;  %v687_v21 = vld [vmem:[%s759_s24 + $0x78] sm:$0xff] }
  0x16   : > { %694 = vmatpush.bf16.msra.mxu2 %v689_v4  ;;  %695 = vmatpush.bf16.msra.mxu3 %v689_v4 }
  0x19   : > { %371 = vmatpush.bf16.msra.mxu0 %v688_v5  ;;  %696 = vmatpush.bf16.msra.mxu1 %v688_v5 }
  0x1a   : > { %697 = vmatpush.bf16.msra.mxu2 %v688_v5  ;;  %698 = vmatpush.bf16.msra.mxu3 %v688_v5 }
  0x1c   : > { %654 = vmatmul.msk.bf16.vlgmr.msra.gmra.mxu0 %vm311_vm1, %v672_v6  ;;  %658 = vmatmul.msk.bf16.vlgmr.msra.gmra.mxu1 %vm311_vm1, %v676_v7 }
  0x1d   : > { %662 = vmatmul.msk.bf16.vlgmr.msra.gmra.mxu2 %vm311_vm1, %v680_v8  ;;  %666 = vmatmul.msk.bf16.vlgmr.msra.gmra.mxu3 %vm311_vm1, %v684_v9 }
  0x2c   : > { %655 = vmatmul.msk.bf16.gmra.mxu0 %vm311_vm1, %v673_v10  ;;  %659 = vmatmul.msk.bf16.gmra.mxu1 %vm311_vm1, %v677_v11 }
  0x2d   : > { %663 = vmatmul.msk.bf16.gmra.mxu2 %vm311_vm1, %v681_v12  ;;  %667 = vmatmul.msk.bf16.gmra.mxu3 %vm311_vm1, %v685_v13 }
  0x3c   : > { %656 = vmatmul.msk.bf16.gmra.mxu0 %vm311_vm1, %v674_v14  ;;  %660 = vmatmul.msk.bf16.gmra.mxu1 %vm311_vm1, %v678_v15 }
  0x3d   : > { %664 = vmatmul.msk.bf16.gmra.mxu2 %vm311_vm1, %v682_v16  ;;  %668 = vmatmul.msk.bf16.gmra.mxu3 %vm311_vm1, %v686_v17 }
  0x4c   : > { %657 = vmatmul.msk.bf16.gmra.mxu0 %vm311_vm1, %v675_v18  ;;  %661 = vmatmul.msk.bf16.gmra.mxu1 %vm311_vm1, %v679_v19 }
  0x4d   : > { %665 = vmatmul.msk.bf16.gmra.mxu2 %vm311_vm1, %v683_v20  ;;  %669 = vmatmul.msk.bf16.gmra.mxu3 %vm311_vm1, %v687_v21 }
  0x99   : > { %v373_v23 = vpop.f32.mrf.mxu0  ;;  %v393_v24 = vpop.f32.mrf.mxu1 }
  0x9a   : > { %v374_v25 = vadd.f32 %v796_v22, %v373_v23  ;;  %v394_v26 = vadd.f32 %v796_v22, %v393_v24 }
  0x9c   : > { %v453_v27 = vmax.f32 %v374_v25, 0.0  ;;  %v461_v28 = vmax.f32 %v394_v26, 0.0 }
  0x9e   : > { %485 = vst [vmem:[%s804_s30] sm:$0xff] %v453_v27 }
  0x9f   : > { %493 = vst [vmem:[%s804_s30 + $0x40] sm:$0xff] %v461_v28 }
  0xa0   : > { %v413_v29 = vpop.f32.mrf.mxu2  ;;  %v433_v30 = vpop.f32.mrf.mxu3 }
  0xa1   : > { %v414_v31 = vadd.f32 %v796_v22, %v413_v29  ;;  %v434_v32 = vadd.f32 %v796_v22, %v433_v30  ;;  %v375_v33 = vpop.f32.mrf.mxu0  ;;  %v395_v34 = vpop.f32.mrf.mxu1 }
  0xa2   : > { %v376_v35 = vadd.f32 %v796_v22, %v375_v33  ;;  %v396_v36 = vadd.f32 %v796_v22, %v395_v34 }
  0xa3   : > { %v469_v37 = vmax.f32 %v414_v31, 0.0  ;;  %v477_v38 = vmax.f32 %v434_v32, 0.0 }
  0xa4   : > { %v454_v39 = vmax.f32 %v376_v35, 0.0  ;;  %v462_v40 = vmax.f32 %v396_v36, 0.0 }
  0xa5   : > { %501 = vst [vmem:[%s804_s30 + $0x80] sm:$0xff] %v469_v37 }
  0xa6   : > { %509 = vst [vmem:[%s804_s30 + $0xc0] sm:$0xff] %v477_v38 }
  0xa7   : > { %486 = vst [vmem:[%s804_s30 + $0x8] sm:$0xff] %v454_v39 }
  0xa8   : > { %494 = vst [vmem:[%s804_s30 + $0x48] sm:$0xff] %v462_v40  ;;  %v415_v41 = vpop.f32.mrf.mxu2  ;;  %v435_v42 = vpop.f32.mrf.mxu3 }
  0xa9   : > { %v416_v43 = vadd.f32 %v796_v22, %v415_v41  ;;  %v436_v44 = vadd.f32 %v796_v22, %v435_v42  ;;  %v378_v45 = vpop.f32.mrf.mxu0  ;;  %v398_v46 = vpop.f32.mrf.mxu1 }
  0xaa   : > { %v379_v47 = vadd.f32 %v796_v22, %v378_v45  ;;  %v399_v48 = vadd.f32 %v796_v22, %v398_v46 }
  0xab   : > { %v470_v49 = vmax.f32 %v416_v43, 0.0  ;;  %v478_v50 = vmax.f32 %v436_v44, 0.0 }
  0xac   : > { %v455_v51 = vmax.f32 %v379_v47, 0.0  ;;  %v463_v52 = vmax.f32 %v399_v48, 0.0 }
  0xad   : > { %502 = vst [vmem:[%s804_s30 + $0x88] sm:$0xff] %v470_v49 }
  0xae   : > { %510 = vst [vmem:[%s804_s30 + $0xc8] sm:$0xff] %v478_v50 }
  0xaf   : > { %487 = vst [vmem:[%s804_s30 + $0x10] sm:$0xff] %v455_v51 }
  0xb0   : > { %495 = vst [vmem:[%s804_s30 + $0x50] sm:$0xff] %v463_v52  ;;  %v418_v53 = vpop.f32.mrf.mxu2  ;;  %v438_v54 = vpop.f32.mrf.mxu3 }
  0xb1   : > { %v419_v55 = vadd.f32 %v796_v22, %v418_v53  ;;  %v439_v56 = vadd.f32 %v796_v22, %v438_v54  ;;  %v380_v57 = vpop.f32.mrf.mxu0  ;;  %v400_v58 = vpop.f32.mrf.mxu1 }
  0xb2   : > { %v381_v59 = vadd.f32 %v796_v22, %v380_v57  ;;  %v401_v60 = vadd.f32 %v796_v22, %v400_v58 }
  0xb3   : > { %v471_v61 = vmax.f32 %v419_v55, 0.0  ;;  %v479_v62 = vmax.f32 %v439_v56, 0.0 }
  0xb4   : > { %v456_v63 = vmax.f32 %v381_v59, 0.0  ;;  %v464_v0 = vmax.f32 %v401_v60, 0.0 }
  0xb5   : > { %503 = vst [vmem:[%s804_s30 + $0x90] sm:$0xff] %v471_v61 }
  0xb6   : > { %511 = vst [vmem:[%s804_s30 + $0xd0] sm:$0xff] %v479_v62 }
  0xb7   : > { %488 = vst [vmem:[%s804_s30 + $0x18] sm:$0xff] %v456_v63 }
  0xb8   : > { %496 = vst [vmem:[%s804_s30 + $0x58] sm:$0xff] %v464_v0  ;;  %v420_v1 = vpop.f32.mrf.mxu2  ;;  %v440_v2 = vpop.f32.mrf.mxu3 }
  0xb9   : > { %v421_v3 = vadd.f32 %v796_v22, %v420_v1  ;;  %v441_v4 = vadd.f32 %v796_v22, %v440_v2  ;;  %v383_v5 = vpop.f32.mrf.mxu0  ;;  %v403_v6 = vpop.f32.mrf.mxu1 }
  0xba   : > { %v384_v7 = vadd.f32 %v796_v22, %v383_v5  ;;  %v404_v8 = vadd.f32 %v796_v22, %v403_v6 }
  0xbb   : > { %v472_v9 = vmax.f32 %v421_v3, 0.0  ;;  %v480_v10 = vmax.f32 %v441_v4, 0.0 }
  0xbc   : > { %v457_v11 = vmax.f32 %v384_v7, 0.0  ;;  %v465_v12 = vmax.f32 %v404_v8, 0.0 }
  0xbd   : > { %504 = vst [vmem:[%s804_s30 + $0x98] sm:$0xff] %v472_v9 }
  0xbe   : > { %512 = vst [vmem:[%s804_s30 + $0xd8] sm:$0xff] %v480_v10 }
  0xbf   : > { %489 = vst [vmem:[%s804_s30 + $0x20] sm:$0xff] %v457_v11 }
  0xc0   : > { %497 = vst [vmem:[%s804_s30 + $0x60] sm:$0xff] %v465_v12  ;;  %v423_v13 = vpop.f32.mrf.mxu2  ;;  %v443_v14 = vpop.f32.mrf.mxu3 }
  0xc1   : > { %v424_v15 = vadd.f32 %v796_v22, %v423_v13  ;;  %v444_v16 = vadd.f32 %v796_v22, %v443_v14  ;;  %v385_v17 = vpop.f32.mrf.mxu0  ;;  %v405_v18 = vpop.f32.mrf.mxu1 }
  0xc2   : > { %v386_v19 = vadd.f32 %v796_v22, %v385_v17  ;;  %v406_v20 = vadd.f32 %v796_v22, %v405_v18 }
  0xc3   : > { %v473_v21 = vmax.f32 %v424_v15, 0.0  ;;  %v481_v23 = vmax.f32 %v444_v16, 0.0 }
  0xc4   : > { %v458_v24 = vmax.f32 %v386_v19, 0.0  ;;  %v466_v25 = vmax.f32 %v406_v20, 0.0 }
  0xc5   : > { %505 = vst [vmem:[%s804_s30 + $0xa0] sm:$0xff] %v473_v21 }
  0xc6   : > { %513 = vst [vmem:[%s804_s30 + $0xe0] sm:$0xff] %v481_v23 }
  0xc7   : > { %490 = vst [vmem:[%s804_s30 + $0x28] sm:$0xff] %v458_v24 }
  0xc8   : > { %498 = vst [vmem:[%s804_s30 + $0x68] sm:$0xff] %v466_v25  ;;  %v425_v26 = vpop.f32.mrf.mxu2  ;;  %v445_v27 = vpop.f32.mrf.mxu3 }
  0xc9   : > { %v426_v28 = vadd.f32 %v796_v22, %v425_v26  ;;  %v446_v29 = vadd.f32 %v796_v22, %v445_v27  ;;  %v388_v30 = vpop.f32.mrf.mxu0  ;;  %v408_v31 = vpop.f32.mrf.mxu1 }
  0xca   : > { %v389_v32 = vadd.f32 %v796_v22, %v388_v30  ;;  %v409_v33 = vadd.f32 %v796_v22, %v408_v31 }
  0xcb   : > { %v474_v34 = vmax.f32 %v426_v28, 0.0  ;;  %v482_v35 = vmax.f32 %v446_v29, 0.0 }
  0xcc   : > { %v459_v36 = vmax.f32 %v389_v32, 0.0  ;;  %v467_v37 = vmax.f32 %v409_v33, 0.0 }
  0xcd   : > { %506 = vst [vmem:[%s804_s30 + $0xa8] sm:$0xff] %v474_v34 }
  0xce   : > { %514 = vst [vmem:[%s804_s30 + $0xe8] sm:$0xff] %v482_v35 }
  0xcf   : > { %491 = vst [vmem:[%s804_s30 + $0x30] sm:$0xff] %v459_v36 }
  0xd0   : > { %499 = vst [vmem:[%s804_s30 + $0x70] sm:$0xff] %v467_v37  ;;  %v428_v38 = vpop.f32.mrf.mxu2  ;;  %v448_v39 = vpop.f32.mrf.mxu3 }
  0xd1   : > { %v429_v40 = vadd.f32 %v796_v22, %v428_v38  ;;  %v449_v41 = vadd.f32 %v796_v22, %v448_v39  ;;  %v390_v42 = vpop.f32.mrf.mxu0  ;;  %v410_v43 = vpop.f32.mrf.mxu1 }
  0xd2   : > { %v391_v44 = vadd.f32 %v796_v22, %v390_v42  ;;  %v411_v45 = vadd.f32 %v796_v22, %v410_v43 }
  0xd3   : > { %v475_v46 = vmax.f32 %v429_v40, 0.0  ;;  %v483_v47 = vmax.f32 %v449_v41, 0.0 }
  0xd4   : > { %v460_v48 = vmax.f32 %v391_v44, 0.0  ;;  %v468_v49 = vmax.f32 %v411_v45, 0.0 }
  0xd5   : > { %507 = vst [vmem:[%s804_s30 + $0xb0] sm:$0xff] %v475_v46 }
  0xd6   : > { %515 = vst [vmem:[%s804_s30 + $0xf0] sm:$0xff] %v483_v47 }
  0xd7   : > { %492 = vst [vmem:[%s804_s30 + $0x38] sm:$0xff] %v460_v48 }
  0xd8   : > { %500 = vst [vmem:[%s804_s30 + $0x78] sm:$0xff] %v468_v49  ;;  %v430_v50 = vpop.f32.mrf.mxu2  ;;  %v450_v51 = vpop.f32.mrf.mxu3 }
  0xd9   : > { %v431_v52 = vadd.f32 %v796_v22, %v430_v50  ;;  %v451_v53 = vadd.f32 %v796_v22, %v450_v51 }
  0xdb   : > { %v476_v54 = vmax.f32 %v431_v52, 0.0  ;;  %v484_v55 = vmax.f32 %v451_v53, 0.0 }
  0xdd   : > { %508 = vst [vmem:[%s804_s30 + $0xb8] sm:$0xff] %v476_v54 }
  0xde   : > { %516 = vst [vmem:[%s804_s30 + $0xf8] sm:$0xff] %v484_v55 }
  0xdf PF: > { %s13_s12 = sadd.s32 1, %s714_s12  }
  0xe0   : > { %p10_p4 = scmp.ge.s32.totalorder %s13_s12, 4  }
  0xe2   :  { %12 = sbr.rel (!%p10_p4) target bundleno = 1 (0x1), region = 62 }

</bundles_post_ra>
